<compile_context>
chip_gen: v7x
topology: tpu7x:2x2x1
jax: 0.10.0
libtpu: 0.0.40
codegen_flags: <defaults>
</compile_context>

<pallas_src>
import functools

import jax
import jax.numpy as jnp
from jax.experimental import pallas as pl
from jax.experimental.pallas import tpu as pltpu

EPS = 1e-6
_LANE = 128
_MAX_TILE = 131072          # upper bound on pixel-tile lanes
_VMEM_FRACTION = 0.70       # block budget: ~90 MiB (v5e/v6e), ~45 MiB (v7x)


def _vmem_capacity_bytes():
    try:
        cap = int(pltpu.get_tpu_info().vmem_capacity_bytes)
        if cap > 0:
            return cap
    except Exception:
        pass
    return 64 << 20   # conservative fallback (v7x per-TensorCore VMEM)


def _select_tiling(num_classes, pred_itemsize, hw, tile_override):
    """Pick (chunk_lanes, tile_lanes, vmem_limit_bytes)."""
    # Chunk width: fill whole vregs for small C; keep 128 for large C to avoid
    # vreg pressure from the 3 live accumulators + x/e/p temporaries.
    cw = 512 if num_classes <= 8 else (256 if num_classes <= 16 else 128)
    hw_lanes = pl.cdiv(hw, _LANE) * _LANE
    cw = min(cw, hw_lanes)
    if tile_override is not None:
        assert tile_override % _LANE == 0, "tile_override must be a multiple of 128"
        cw = min(cw, tile_override)

    cap = _vmem_capacity_bytes()
    budget = int(cap * _VMEM_FRACTION)
    sub = 16 if pred_itemsize == 2 else 8                 # pred sublane packing
    c_pad = pl.cdiv(num_classes, sub) * sub
    # Double-buffered bytes per pixel lane: pred block + (sublane-padded) target.
    per_lane = 2 * (c_pad * pred_itemsize + 32)
    tp = max(cw, (budget // per_lane // cw) * cw)
    tp = min(tp, (_MAX_TILE // cw) * cw, pl.cdiv(hw, cw) * cw)
    if tile_override is not None:
        tp = min(tp, max(cw, (tile_override // cw) * cw))

    # Explicit scoped-VMEM limit so the big tile is admitted (default limits
    # are ~16/32 MiB), plus headroom for compiler-internal scratch.
    c_pad32 = pl.cdiv(num_classes, 8) * 8
    block_bytes = per_lane * tp + 2 * 3 * c_pad32 * cw * 4
    vmem_limit = int(min(cap, block_bytes + (8 << 20)))
    return cw, tp, vmem_limit


def _dice_partial_kernel(pred_ref, tgt_ref, out_ref, *, hw, tile_p, chunk,
                         n_tiles, tiles_per_split, ignore_index, needs_mask,
                         needs_tile_gate, unroll):
    """Accumulates (intersection, pred_sum, target_sum) lane-partials for one
    (image, pixel-split, pixel-tile) grid point into the resident out block."""
    s_idx = pl.program_id(1)
    t_idx = pl.program_id(2)
    logical_tile = s_idx * tiles_per_split + t_idx

    @pl.when(t_idx == 0)
    def _init():
        out_ref[...] = jnp.zeros_like(out_ref)

    num_classes = pred_ref.shape[0]
    n_chunks = tile_p // chunk

    # Hoisted out of the chunk loop (JAX does not CSE broadcast_in_dim).
    cls = jax.lax.broadcasted_iota(jnp.int32, (num_classes, chunk), 0)
    lane = (jax.lax.broadcasted_iota(jnp.int32, (1, chunk), 1)
            if needs_mask else None)
    tile_base = logical_tile * tile_p

    def make_chunk_body(mask_tail):
        def chunk_body(j, carry):
            inter, psum, tsum = carry
            off = pl.multiple_of(j * chunk, _LANE)

            x = pred_ref[:, pl.ds(off, chunk)].astype(jnp.float32)   # (C, cw)
            t = tgt_ref[:, pl.ds(off, chunk)].astype(jnp.int32)      # (1, cw)

            # softmax over the class (sublane) axis
            m = jnp.max(x, axis=0, keepdims=True)
            e = jnp.exp(x - m)
            s = jnp.sum(e, axis=0, keepdims=True)
            p = e * pl.reciprocal(s, approx=True)                    # (C, cw)

            valid = t != ignore_index                                # (1, cw)
            if mask_tail:
                # Ragged tail: padded block data must not contribute.
                pix = tile_base + off + lane
                valid = jnp.logical_and(valid, pix < hw)
            hit = jnp.logical_and(valid, t == cls)                   # (C, cw)

            inter = inter + jnp.where(hit, p, 0.0)
            psum = psum + jnp.where(valid, p, 0.0)
            tsum = tsum + hit.astype(jnp.float32)
            return inter, psum, tsum
        return chunk_body

    def accumulate(mask_tail):
        zeros = jnp.zeros((num_classes, chunk), jnp.float32)
        inter, psum, tsum = jax.lax.fori_loop(
            0, n_chunks, make_chunk_body(mask_tail), (zeros, zeros, zeros),
            unroll=unroll)
        out_ref[0, :, :] += inter
        out_ref[1, :, :] += psum
        out_ref[2, :, :] += tsum

    def run():
        if needs_mask:
            # Only the last logical tile pays the pixel-index mask.
            @pl.when(logical_tile == n_tiles - 1)
            def _masked():
                accumulate(True)

            @pl.when(logical_tile != n_tiles - 1)
            def _unmasked():
                accumulate(False)
        else:
            accumulate(False)

    if needs_tile_gate:
        # Pixel splits may own a phantom trailing tile (its index_map is
        # clamped to the last real tile); skip its accumulation entirely.
        @pl.when(logical_tile < n_tiles)
        def _valid():
            run()
    else:
        run()


def dice_loss(pred, target, num_classes, ignore_index=255, tile_override=None):
    """pred: (N, C, H, W) logits (f32 or bf16 -- prefer bf16 when the producer
    can supply it; pred bytes dominate HBM traffic). target: (N, H, W) ints."""
    N, C, H, W = pred.shape
    assert C == num_classes
    HW = H * W

    pred3 = pred.reshape(N, C, HW)                        # free reshape
    # Stream target as uint8 when labels + ignore_index fit (4x less traffic).
    if 0 <= ignore_index <= 255 and num_classes <= 256:
        tgt3 = target.reshape(N, 1, HW).astype(jnp.uint8)
    else:
        tgt3 = target.reshape(N, 1, HW).astype(jnp.int32)

    cw, tp, vmem_limit = _select_tiling(C, pred3.dtype.itemsize, HW,
                                        tile_override)
    n_tiles = pl.cdiv(HW, tp)
    needs_mask = (n_tiles * tp != HW)
    # Pixel-split axis so both v7x TensorCores are busy even at N == 1
    # (harmless one extra tiny partial on single-TC v5e/v6e).
    n_splits = min(2, n_tiles)
    tiles_per_split = pl.cdiv(n_tiles, n_splits)
    needs_tile_gate = (n_splits * tiles_per_split != n_tiles)
    unroll = max(1, min(tp // cw, max(1, 1024 // cw)))

    if needs_tile_gate:
        def tile_idx(s, t):
            return jnp.minimum(s * tiles_per_split + t, n_tiles - 1)
    else:
        def tile_idx(s, t):
            return s * tiles_per_split + t

    kernel = functools.partial(
        _dice_partial_kernel, hw=HW, tile_p=tp, chunk=cw, n_tiles=n_tiles,
        tiles_per_split=tiles_per_split, ignore_index=ignore_index,
        needs_mask=needs_mask, needs_tile_gate=needs_tile_gate, unroll=unroll)

    part = pl.pallas_call(
        kernel,
        out_shape=jax.ShapeDtypeStruct((N, n_splits, 3, C, cw), jnp.float32),
        grid_spec=pltpu.PrefetchScalarGridSpec(
            num_scalar_prefetch=0,
            grid=(N, n_splits, tiles_per_split),
            in_specs=[
                pl.BlockSpec((None, C, tp),
                             lambda n, s, t: (n, 0, tile_idx(s, t))),
                pl.BlockSpec((None, 1, tp),
                             lambda n, s, t: (n, 0, tile_idx(s, t))),
            ],
            out_specs=pl.BlockSpec((None, None, 3, C, cw),
                                   lambda n, s, t: (n, s, 0, 0, 0)),
        ),
        compiler_params=pltpu.CompilerParams(
            dimension_semantics=("parallel", "parallel", "arbitrary"),
            vmem_limit_bytes=vmem_limit),
    )(pred3, tgt3)

    # Tiny finalize in plain JAX: collapse batch / split / lane partials.
    sums = jnp.sum(part, axis=(0, 1, 4))          # (3, C)
    inter, psum, tsum = sums[0], sums[1], sums[2]
    dice = (2.0 * inter + EPS) / (psum + tsum + EPS)
    return jnp.sum(1.0 - dice) / num_classes


def dice_loss_ref(pred, target, num_classes, ignore_index=255):
    """Pure-JAX reference matching the PyTorch forward."""
    p = jax.nn.softmax(pred.astype(jnp.float32), axis=1)
    mask = (target != ignore_index).astype(jnp.float32)
    loss = 0.0
    for i in range(num_classes):
        pred_i = p[:, i] * mask
        target_i = (target == i).astype(jnp.float32) * mask
        inter = jnp.sum(pred_i * target_i)
        dice = (2.0 * inter + EPS) / (jnp.sum(pred_i) + jnp.sum(target_i) + EPS)
        loss += 1.0 - dice
    return loss / num_classes


if __name__ == "__main__":
    key = jax.random.PRNGKey(0)
    loss_fn = jax.jit(dice_loss, static_argnums=(2, 3, 4))
    # Tolerances account for the EUP approximate reciprocal in the softmax.
    TOL = 1e-2

    # --- test 1: even shapes, f32, auto tile ---
    num_classes, ignore_index = 4, 255
    N, H, W = 2, 16, 16
    k1, k2, k3, key = jax.random.split(key, 4)
    pred = jax.random.normal(k1, (N, num_classes, H, W), dtype=jnp.float32)
    target = jax.random.randint(k2, (N, H, W), 0, num_classes, dtype=jnp.int32)
    target = jnp.where(jax.random.bernoulli(k3, 0.1, (N, H, W)),
                       jnp.int32(ignore_index), target)
    out = jax.block_until_ready(
        loss_fn(pred, target, num_classes, ignore_index, None))
    ref = dice_loss_ref(pred, target, num_classes, ignore_index)
    assert jnp.allclose(out, ref, atol=TOL, rtol=TOL), (out, ref)

    # --- test 2: ragged pixel count (H*W not a multiple of 128), C=5 ---
    num_classes2 = 5
    N2, H2, W2 = 2, 13, 17
    k1, k2, k3, key = jax.random.split(key, 4)
    pred2 = jax.random.normal(k1, (N2, num_classes2, H2, W2), dtype=jnp.float32)
    target2 = jax.random.randint(k2, (N2, H2, W2), 0, num_classes2,
                                 dtype=jnp.int32)
    target2 = jnp.where(jax.random.bernoulli(k3, 0.15, (N2, H2, W2)),
                        jnp.int32(ignore_index), target2)
    out2 = jax.block_until_ready(
        loss_fn(pred2, target2, num_classes2, ignore_index, None))
    ref2 = dice_loss_ref(pred2, target2, num_classes2, ignore_index)
    assert jnp.allclose(out2, ref2, atol=TOL, rtol=TOL), (out2, ref2)

    # --- test 3: force multiple pixel tiles + pixel-split + ragged tail ---
    out3 = jax.block_until_ready(
        loss_fn(pred2, target2, num_classes2, ignore_index, 128))
    assert jnp.allclose(out3, ref2, atol=TOL, rtol=TOL), (out3, ref2)

    # --- test 4: bf16 streaming path (cast to f32 inside the kernel) ---
    pred_bf = pred.astype(jnp.bfloat16)
    out4 = jax.block_until_ready(
        loss_fn(pred_bf, target, num_classes, ignore_index, None))
    ref4 = dice_loss_ref(pred_bf, target, num_classes, ignore_index)
    assert jnp.allclose(out4, ref4, atol=2e-2, rtol=2e-2), (out4, ref4)

    # --- test 5: N=1, odd tile count -> phantom-tile gate + ragged mask ---
    N5, H5, W5 = 1, 15, 25      # HW = 375 -> 3 tiles of 128, split into 2x2
    k1, k2, k3, key = jax.random.split(key, 4)
    pred5 = jax.random.normal(k1, (N5, num_classes, H5, W5), dtype=jnp.float32)
    target5 = jax.random.randint(k2, (N5, H5, W5), 0, num_classes,
                                 dtype=jnp.int32)
    target5 = jnp.where(jax.random.bernoulli(k3, 0.1, (N5, H5, W5)),
                        jnp.int32(ignore_index), target5)
    out5 = jax.block_until_ready(
        loss_fn(pred5, target5, num_classes, ignore_index, 128))
    ref5 = dice_loss_ref(pred5, target5, num_classes, ignore_index)
    assert jnp.allclose(out5, ref5, atol=TOL, rtol=TOL), (out5, ref5)

    # --- test 6: larger class count (C=19 -> 128-lane chunk path) ---
    num_classes6 = 19
    N6, H6, W6 = 1, 16, 16
    k1, k2, k3, key = jax.random.split(key, 4)
    pred6 = jax.random.normal(k1, (N6, num_classes6, H6, W6), dtype=jnp.float32)
    target6 = jax.random.randint(k2, (N6, H6, W6), 0, num_classes6,
                                 dtype=jnp.int32)
    target6 = jnp.where(jax.random.bernoulli(k3, 0.1, (N6, H6, W6)),
                        jnp.int32(ignore_index), target6)
    out6 = jax.block_until_ready(
        loss_fn(pred6, target6, num_classes6, ignore_index, None))
    ref6 = dice_loss_ref(pred6, target6, num_classes6, ignore_index)
    assert jnp.allclose(out6, ref6, atol=TOL, rtol=TOL), (out6, ref6)

    print("KERNEL_OK")
</pallas_src>

<mosaic_0001>
module attributes {stable_mosaic.version = 11 : i64} {
  func.func @_dice_partial_kernel(%arg0: i32, %arg1: i32, %arg2: i32, %arg3: memref<1x4x256xf32, #tpu.memory_space<vmem>>, %arg4: memref<1x1x256xi8, #tpu.memory_space<vmem>>, %arg5: memref<1x1x3x4x256xf32, #tpu.memory_space<vmem>>) attributes {dimension_semantics = [#tpu.dimension_semantics<parallel>, #tpu.dimension_semantics<parallel>, #tpu.dimension_semantics<arbitrary>], iteration_bounds = array<i64: 2, 1, 1>, scalar_prefetch = 0 : i64, scratch_operands = 0 : i64, tpu.core_type = #tpu.core_type<tc>, window_params = [{transform_indices = @transform_0, window_bounds = array<i64: 1, 4, 256>}, {transform_indices = @transform_1, window_bounds = array<i64: 1, 1, 256>}, {transform_indices = @transform_2, window_bounds = array<i64: 1, 1, 3, 4, 256>}]} {
    %c0_i32 = arith.constant 0 : i32
    %0 = arith.cmpi eq, %arg2, %c0_i32 : i32
    %1 = arith.extui %0 : i1 to i32
    %c0_i32_0 = arith.constant 0 : i32
    %2 = arith.cmpi ne, %1, %c0_i32_0 : i32
    scf.if %2 {
      %cst_37 = arith.constant 0.000000e+00 : f32
      %59 = vector.broadcast %cst_37 : f32 to vector<3x4x256xf32>
      %c0_38 = arith.constant 0 : index
      %c0_39 = arith.constant 0 : index
      %c0_40 = arith.constant 0 : index
      %c0_41 = arith.constant 0 : index
      %c0_42 = arith.constant 0 : index
      %60 = vector.load %arg5[%c0_38, %c0_39, %c0_40, %c0_41, %c0_42] : memref<1x1x3x4x256xf32, #tpu.memory_space<vmem>>, vector<1x1x3x4x256xf32>
      %61 = vector.shape_cast %60 : vector<1x1x3x4x256xf32> to vector<3x4x256xf32>
      %62 = vector.shape_cast %59 : vector<3x4x256xf32> to vector<1x1x3x4x256xf32>
      tpu.vector_store %arg5[%c0_38, %c0_39, %c0_40, %c0_41, %c0_42], %62 {strides = array<i32>} : memref<1x1x3x4x256xf32, #tpu.memory_space<vmem>>, vector<1x1x3x4x256xf32>,
    } else {
    }
    %3 = tpu.iota {dimensions = array<i32: 0>} : vector<4x256xi32>
    %cst = arith.constant 0.000000e+00 : f32
    %4 = vector.broadcast %cst : f32 to vector<4x256xf32>
    %c0_i32_1 = arith.constant 0 : i32
    %c256_i32 = arith.constant 256 : i32
    %5 = arith.muli %c0_i32_1, %c256_i32 : i32
    %6 = tpu.assume_multiple %5, 128 : i32
    %c0 = arith.constant 0 : index
    %c0_2 = arith.constant 0 : index
    %7 = arith.index_cast %6 : i32 to index
    %8 = vector.load %arg3[%c0, %c0_2, %7] : memref<1x4x256xf32, #tpu.memory_space<vmem>>, vector<1x4x256xf32>
    %9 = vector.shape_cast %8 : vector<1x4x256xf32> to vector<4x256xf32>
    %c0_3 = arith.constant 0 : index
    %c0_4 = arith.constant 0 : index
    %10 = arith.index_cast %6 : i32 to index
    %11 = vector.load %arg4[%c0_3, %c0_4, %10] : memref<1x1x256xi8, #tpu.memory_space<vmem>>, vector<1x1x256xi8>
    %12 = vector.shape_cast %11 : vector<1x1x256xi8> to vector<1x256xi8>
    %13 = arith.extui %12 : vector<1x256xi8> to vector<1x256xi32>
    %cst_5 = arith.constant dense<0xFF800000> : vector<256xf32>
    %14 = vector.multi_reduction <maximumf>, %9, %cst_5 [0] : vector<4x256xf32> to vector<256xf32>
    %15 = vector.shape_cast %14 : vector<256xf32> to vector<1x256xf32>
    %16 = vector.broadcast %15 : vector<1x256xf32> to vector<4x256xf32>
    %17 = arith.subf %9, %16 : vector<4x256xf32>
    %18 = math.exp %17 : vector<4x256xf32>
    %cst_6 = arith.constant dense<0.000000e+00> : vector<256xf32>
    %19 = vector.multi_reduction <add>, %18, %cst_6 [0] : vector<4x256xf32> to vector<256xf32>
    %20 = vector.shape_cast %19 : vector<256xf32> to vector<1x256xf32>
    %21 = tpu.reciprocal %20 {approx = true} : vector<1x256xf32> -> vector<1x256xf32>
    %22 = vector.broadcast %21 : vector<1x256xf32> to vector<4x256xf32>
    %23 = arith.mulf %18, %22 : vector<4x256xf32>
    %c255_i32 = arith.constant 255 : i32
    %24 = vector.broadcast %c255_i32 : i32 to vector<1x256xi32>
    %25 = arith.cmpi ne, %13, %24 : vector<1x256xi32>
    %26 = vector.broadcast %13 : vector<1x256xi32> to vector<4x256xi32>
    %27 = arith.cmpi eq, %26, %3 : vector<4x256xi32>
    %28 = vector.broadcast %25 : vector<1x256xi1> to vector<4x256xi1>
    %29 = arith.andi %28, %27 : vector<4x256xi1>
    %cst_7 = arith.constant 0.000000e+00 : f32
    %30 = vector.broadcast %cst_7 : f32 to vector<4x256xf32>
    %31 = arith.select %29, %23, %30 : vector<4x256xi1>, vector<4x256xf32>
    %32 = arith.addf %4, %31 : vector<4x256xf32>
    %cst_8 = arith.constant 0.000000e+00 : f32
    %33 = vector.shape_cast %25 : vector<1x256xi1> to vector<1x256xi1>
    %34 = vector.broadcast %33 : vector<1x256xi1> to vector<4x256xi1>
    %35 = vector.broadcast %cst_8 : f32 to vector<4x256xf32>
    %36 = arith.select %34, %23, %35 : vector<4x256xi1>, vector<4x256xf32>
    %37 = arith.addf %4, %36 : vector<4x256xf32>
    %38 = arith.extui %29 : vector<4x256xi1> to vector<4x256xi32>
    %39 = arith.sitofp %38 : vector<4x256xi32> to vector<4x256xf32>
    %40 = arith.addf %4, %39 : vector<4x256xf32>
    %c1_i32 = arith.constant 1 : i32
    %c0_9 = arith.constant 0 : index
    %c0_10 = arith.constant 0 : index
    %c0_11 = arith.constant 0 : index
    %c0_12 = arith.constant 0 : index
    %c0_13 = arith.constant 0 : index
    %41 = vector.load %arg5[%c0_9, %c0_10, %c0_11, %c0_12, %c0_13] : memref<1x1x3x4x256xf32, #tpu.memory_space<vmem>>, vector<1x1x1x4x256xf32>
    %42 = vector.shape_cast %41 : vector<1x1x1x4x256xf32> to vector<4x256xf32>
    %43 = arith.addf %42, %32 : vector<4x256xf32>
    %c0_14 = arith.constant 0 : index
    %c0_15 = arith.constant 0 : index
    %c0_16 = arith.constant 0 : index
    %c0_17 = arith.constant 0 : index
    %c0_18 = arith.constant 0 : index
    %44 = vector.load %arg5[%c0_14, %c0_15, %c0_16, %c0_17, %c0_18] : memref<1x1x3x4x256xf32, #tpu.memory_space<vmem>>, vector<1x1x1x4x256xf32>
    %45 = vector.shape_cast %44 : vector<1x1x1x4x256xf32> to vector<4x256xf32>
    %46 = vector.shape_cast %43 : vector<4x256xf32> to vector<1x1x1x4x256xf32>
    tpu.vector_store %arg5[%c0_14, %c0_15, %c0_16, %c0_17, %c0_18], %46 {strides = array<i32>} : memref<1x1x3x4x256xf32, #tpu.memory_space<vmem>>, vector<1x1x1x4x256xf32>,
    %c0_19 = arith.constant 0 : index
    %c0_20 = arith.constant 0 : index
    %c1 = arith.constant 1 : index
    %c0_21 = arith.constant 0 : index
    %c0_22 = arith.constant 0 : index
    %47 = vector.load %arg5[%c0_19, %c0_20, %c1, %c0_21, %c0_22] : memref<1x1x3x4x256xf32, #tpu.memory_space<vmem>>, vector<1x1x1x4x256xf32>
    %48 = vector.shape_cast %47 : vector<1x1x1x4x256xf32> to vector<4x256xf32>
    %49 = arith.addf %48, %37 : vector<4x256xf32>
    %c0_23 = arith.constant 0 : index
    %c0_24 = arith.constant 0 : index
    %c1_25 = arith.constant 1 : index
    %c0_26 = arith.constant 0 : index
    %c0_27 = arith.constant 0 : index
    %50 = vector.load %arg5[%c0_23, %c0_24, %c1_25, %c0_26, %c0_27] : memref<1x1x3x4x256xf32, #tpu.memory_space<vmem>>, vector<1x1x1x4x256xf32>
    %51 = vector.shape_cast %50 : vector<1x1x1x4x256xf32> to vector<4x256xf32>
    %52 = vector.shape_cast %49 : vector<4x256xf32> to vector<1x1x1x4x256xf32>
    tpu.vector_store %arg5[%c0_23, %c0_24, %c1_25, %c0_26, %c0_27], %52 {strides = array<i32>} : memref<1x1x3x4x256xf32, #tpu.memory_space<vmem>>, vector<1x1x1x4x256xf32>,
    %c0_28 = arith.constant 0 : index
    %c0_29 = arith.constant 0 : index
    %c2 = arith.constant 2 : index
    %c0_30 = arith.constant 0 : index
    %c0_31 = arith.constant 0 : index
    %53 = vector.load %arg5[%c0_28, %c0_29, %c2, %c0_30, %c0_31] : memref<1x1x3x4x256xf32, #tpu.memory_space<vmem>>, vector<1x1x1x4x256xf32>
    %54 = vector.shape_cast %53 : vector<1x1x1x4x256xf32> to vector<4x256xf32>
    %55 = arith.addf %54, %40 : vector<4x256xf32>
    %c0_32 = arith.constant 0 : index
    %c0_33 = arith.constant 0 : index
    %c2_34 = arith.constant 2 : index
    %c0_35 = arith.constant 0 : index
    %c0_36 = arith.constant 0 : index
    %56 = vector.load %arg5[%c0_32, %c0_33, %c2_34, %c0_35, %c0_36] : memref<1x1x3x4x256xf32, #tpu.memory_space<vmem>>, vector<1x1x1x4x256xf32>
    %57 = vector.shape_cast %56 : vector<1x1x1x4x256xf32> to vector<4x256xf32>
    %58 = vector.shape_cast %55 : vector<4x256xf32> to vector<1x1x1x4x256xf32>
    tpu.vector_store %arg5[%c0_32, %c0_33, %c2_34, %c0_35, %c0_36], %58 {strides = array<i32>} : memref<1x1x3x4x256xf32, #tpu.memory_space<vmem>>, vector<1x1x1x4x256xf32>,
    return
  }
  func.func @transform_0(%arg0: i32, %arg1: i32, %arg2: i32) -> (i32, i32, i32) {
    %c1_i32 = arith.constant 1 : i32
    %0 = arith.muli %arg1, %c1_i32 : i32
    %1 = arith.addi %0, %arg2 : i32
    %c0_i32 = arith.constant 0 : i32
    %c0_i32_0 = arith.constant 0 : i32
    return %arg0, %c0_i32, %1 : i32, i32, i32
  }
  func.func @transform_1(%arg0: i32, %arg1: i32, %arg2: i32) -> (i32, i32, i32) {
    %c1_i32 = arith.constant 1 : i32
    %0 = arith.muli %arg1, %c1_i32 : i32
    %1 = arith.addi %0, %arg2 : i32
    %c0_i32 = arith.constant 0 : i32
    %c0_i32_0 = arith.constant 0 : i32
    return %arg0, %c0_i32, %1 : i32, i32, i32
  }
  func.func @transform_2(%arg0: i32, %arg1: i32, %arg2: i32) -> (i32, i32, i32, i32, i32) {
    %c0_i32 = arith.constant 0 : i32
    %c0_i32_0 = arith.constant 0 : i32
    %c0_i32_1 = arith.constant 0 : i32
    %c0_i32_2 = arith.constant 0 : i32
    return %arg0, %arg1, %c0_i32, %c0_i32_0, %c0_i32_1 : i32, i32, i32, i32, i32
  }
}

</mosaic_0001>

<bundles_post_ra>
// kernel: dice_loss.1
= control target key start
LH: loop header
LB: loop body
LE: loop exit
PB: predicated region body
PF: predicated region fallthrough
CT: control target
= control target key end

     0   :  { %s578_s9 = smov 0   ;;  %s580_s10 = smov 0   ;;  %s662_s0 = inlined_call_operand.vmem [shape: f32[2,4,256], index: 0, kind: input, shape index: {}]   ;;  %s663_s1 = inlined_call_operand.vmem [shape: u8[2,1,256], index: 1, kind: input, shape index: {}]   ;;  %s664_s2 = inlined_call_operand.vmem [shape: f32[2,1,3,4,256], index: 2, kind: output, shape index: {}]  }
   0x1   :  { %s582_s11 = smov 0  }
   0x2 LB: > { %s31_s12 = sadd.s32 1, %s555_s10  ;;  %p489_p0 = scmp.ge.s32.totalorder %s559_s11, 1  ;;  %s559_s11 = sphi %s582_s11, %s12_s11   ;;  %s555_s10 = sphi %s580_s10, %s672_s10   ;;  %s551_s9 = sphi %s578_s9, %s671_s9  }
   0x3   : > { %p33_p1 = scmp.ge.s32.totalorder %s31_s12, 2  ;;  %p164_p2 = scmp.lt.s32.totalorder %s559_s11, 3 }
   0x5   : > { %s674_s12 = smov (%p33_p1, %s31_s12), 0  ;;  %p165_p3 = pnand %p489_p0, %p164_p2 }
   0x6   : > { %p206_p4 = scmp.lt.s32.totalorder (!%p165_p3), %s551_s9, 1  ;;  %v243_v0 = vlaneseq (!%p165_p3)  ;;  %vm252_vm0 = vcmask (!%p165_p3), 1043456   ;;  %v561_v18 = vmov (!%p165_p3), 0   ;;  %v562_v36 = vmov (!%p165_p3), 0.0  }
   0x7   : > { %168 = sbr.rel (%p165_p3) target bundleno = 86 (0x56), region = 28 }
   0x8   : > { %v244_v1 = vshrl.u32 (!%p165_p3), %v243_v0, 7 }
   0xa   : > { %v301_v8 = vsub.s32 (!%p165_p3), 0, %v244_v1  ;;  %v305_v10 = vsub.s32 (!%p165_p3), 4, %v244_v1 }
   0xe   : > { %s676_s9 = smov (!%p206_p4, %s551_s9), 1 }
   0xf   : > { %s502_s13 = sshll.u32 %s676_s9, 3  ;;  %s492_s17 = sshll.u32 %s676_s9, 1 }
  0x10   : > { %s213_s16 = scalar_lea.vmem %s662_s0, %s502_s13  ;;  %s224_s20 = scalar_lea.vmem %s663_s1, %s492_s17 }
  0x11   : > { %v245_v2 = vld [vmem:[%s213_s16] sm:$0xff]  ;;  %s503_s21 = smul.u32 24, %s676_s9 }
  0x12   : > { %v250_v3 = vcombine.high %v245_v2, %v245_v2  ;;  %v253_v4 = vsel %vm252_vm0, %v245_v2, -inf  ;;  %v246_v5 = vld [vmem:[%s224_s20] sm:$0x3] }
  0x13   : > { %v254_v6 = vrot.slane %v253_v4, 4  ;;  %v247_v7 = vunpack.c.0.s8 %v246_v5  ;;  %s636_s24 = scalar_lea.vmem %s664_s2, %s503_s21 }
  0x14   : > { %v260_v9 = vsel %vm252_vm0, %v250_v3, -inf }
  0x15   : > { %v255_v11 = vmax.f32 %v253_v4, %v254_v6  ;;  %v261_v12 = vrot.slane %v260_v9, 4  ;;  %v248_v13 = vand.u32 255, %v247_v7 }
  0x17   : > { %v256_v14 = vrot.slane %v255_v11, 2  ;;  %v262_v15 = vmax.f32 %v260_v9, %v261_v12  ;;  %vm298_vm1 = vcmp.ne.s32.totalorder %v248_v13, 255  ;;  %v302_v16 = vrot.slane %v248_v13, %v301_v8 }
  0x18   : > { %v306_v17 = vrot.slane %v248_v13, %v305_v10  ;;  %v317_v19 = vsel %vm298_vm1, 1, %v561_v18 }
  0x19   : > { %v257_v20 = vmax.f32 %v255_v11, %v256_v14  ;;  %v263_v21 = vrot.slane %v262_v15, 2  ;;  %v310_v22 = vrot.slane %v302_v16, %v301_v8  ;;  %v321_v23 = vrot.slane %v317_v19, %v301_v8 }
  0x1a   : > { %v314_v24 = vrot.slane %v306_v17, %v301_v8  ;;  %v325_v25 = vrot.slane %v317_v19, %v305_v10 }
  0x1b   : > { %v258_v26 = vrot.slane %v257_v20, 1  ;;  %v264_v27 = vmax.f32 %v262_v15, %v263_v21  ;;  %vm315_vm2 = vcmp.eq.s32.totalorder %v310_v22, %v244_v1  ;;  %v329_v28 = vrot.slane %v321_v23, %v301_v8 }
  0x1c   : > { %vm608_vm3 = vcmp.eq.s32.totalorder %v314_v24, %v244_v1  ;;  %v333_v30 = vrot.slane %v325_v25, %v301_v8 }
  0x1d   : > { %v259_v31 = vmax.f32 %v257_v20, %v258_v26  ;;  %v265_v32 = vrot.slane %v264_v27, 1  ;;  %vm334_vm4 = vcmp.eq.s32.totalorder %v329_v28, 1 }
  0x1e   : > { %vm613_vm5 = vcmp.eq.s32.totalorder %v333_v30, 1  ;;  %vm618_vm6 = vmand %vm334_vm4, %vm315_vm2 }
  0x1f   : > { %v266_v35 = vmax.f32 %v264_v27, %v265_v32  ;;  %vm337_vm7 = vmand %vm613_vm5, %vm608_vm3  ;;  %v494_v37 = vsel %vm618_vm6, 1.0, %v562_v36 }
  0x20   : > { %v495_v38 = vsel %vm337_vm7, 1.0, %v562_v36 }
  0x21   : > { %v269_v39 = vcombine.low %v259_v31, %v266_v35  ;;  %v374_v40 = vcombine.low %v494_v37, %v495_v38 }
  0x23   : > { %v271_v41 = vsub.f32 %v245_v2, %v269_v39  ;;  %499 = vst [vmem:[%s636_s24 + $0x10] sm:$0xff] %v374_v40 }
  0x25   : > { %v272_v42 = vmul.f32 1.442695, %v271_v41 }
  0x27   : > { %531 = vpow2.f32 %v272_v42 }
  0x31   : > { %v532_v43 = vpop.eup %531 }
  0x32   : > { %v275_v44 = vcombine.high %v532_v43, %v532_v43  ;;  %v277_v45 = vsel %vm252_vm0, %v532_v43, 0.0 }
  0x33   : > { %v278_v46 = vrot.slane %v277_v45, 4 }
  0x34   : > { %v284_v47 = vsel %vm252_vm0, %v275_v44, 0.0 }
  0x35   : > { %v279_v48 = vadd.f32 %v278_v46, %v277_v45  ;;  %v285_v49 = vrot.slane %v284_v47, 4 }
  0x37   : > { %v280_v50 = vrot.slane %v279_v48, 2  ;;  %v286_v51 = vadd.f32 %v285_v49, %v284_v47 }
  0x39   : > { %v281_v52 = vadd.f32 %v280_v50, %v279_v48  ;;  %v287_v53 = vrot.slane %v286_v51, 2 }
  0x3b   : > { %v282_v54 = vrot.slane %v281_v52, 1  ;;  %v288_v55 = vadd.f32 %v287_v53, %v286_v51 }
  0x3d   : > { %v283_v56 = vadd.f32 %v282_v54, %v281_v52  ;;  %v289_v57 = vrot.slane %v288_v55, 1 }
  0x3f   : > { %v290_v58 = vadd.f32 %v289_v57, %v288_v55  ;;  %533 = vrcp.f32 %v283_v56 }
  0x41   : > { %535 = vrcp.f32 %v290_v58 }
  0x49   : > { %v534_v59 = vpop.eup %533 }
  0x4b   : > { %v536_v60 = vpop.eup %535 }
  0x4c   : > { %v295_v61 = vcombine.low %v534_v59, %v536_v60 }
  0x4e   : > { %v297_v62 = vmul.f32 %v532_v43, %v295_v61 }
  0x50   : > { %v339_v63 = vcombine.high %v297_v62, %v297_v62  ;;  %v341_v0 = vsel %vm618_vm6, %v297_v62, 0.0  ;;  %v345_v1 = vsel %vm334_vm4, %v297_v62, 0.0 }
  0x52   : > { %v342_v2 = vsel %vm337_vm7, %v339_v63, 0.0  ;;  %v346_v3 = vsel %vm613_vm5, %v339_v63, 0.0 }
  0x53   : > { %v358_v4 = vcombine.low %v341_v0, %v342_v2  ;;  %v366_v5 = vcombine.low %v345_v1, %v346_v3 }
  0x55   : > { %361 = vst [vmem:[%s636_s24] sm:$0xff] %v358_v4  ;;  %497 = vst [vmem:[%s636_s24 + $0x8] sm:$0xff] %v366_v5 }
  0x56 PF: > { %s12_s11 = sadd.s32 1, %s559_s11   ;;  %s671_s9 = smov %s555_s10 }
  0x57   : > { %p9_p5 = scmp.ge.s32.totalorder %s12_s11, 4   ;;  %s672_s10 = smov %s674_s12 }
  0x59   :  { %11 = sbr.rel (!%p9_p5) target bundleno = 2 (0x2), region = 67 }

</bundles_post_ra>
